<compile_context>
chip_gen: v5e
topology: v5e:2x2
jax: 0.10.0
libtpu: 0.0.40
codegen_flags: <defaults>
</compile_context>

<pallas_src>
import functools

import jax
import jax.numpy as jnp
from jax import lax
from jax.experimental import pallas as pl
from jax.experimental.pallas import tpu as pltpu


IN_FEATURES = 11
TB_DEFAULT = 16384  # batch rows per grid step (multiple of 128)


def _round_up(n, m):
    return ((n + m - 1) // m) * m


def _mlp_kernel(x_ref, w1_ref, b1_ref, w2_ref, b2_ref, w3_ref, b3_ref, o_ref,
                *, slab, num_slabs):
    # x_ref: (tb, 11) f32  (batch on sublanes); o_ref: (2, tb) f32 (batch on lanes).
    # Weights bf16 (out, in); b1/b2 bf16 (out, 1); b3 f32 (2, 1).
    w1 = w1_ref[...]
    b1 = b1_ref[...]
    w2 = w2_ref[...]
    b2 = b2_ref[...]
    w3 = w3_ref[...]
    b3 = b3_ref[...]

    def slab_body(j, carry):
        off = pl.multiple_of(j * slab, slab) if num_slabs > 1 else 0
        xs = x_ref[pl.ds(off, slab), :].astype(jnp.bfloat16)          # (slab, 11)
        # W1 @ xs^T  -> (64, slab), f32 accumulation on the MXU.
        h1 = lax.dot_general(w1, xs, (((1,), (1,)), ((), ())),
                             preferred_element_type=jnp.float32)
        h1 = jnp.maximum(h1.astype(jnp.bfloat16) + b1, 0)             # bf16 bias+ReLU
        h2 = jnp.dot(w2, h1, preferred_element_type=jnp.float32)      # (32, slab)
        h2 = jnp.maximum(h2.astype(jnp.bfloat16) + b2, 0)
        out = jnp.dot(w3, h2, preferred_element_type=jnp.float32)     # (2, slab)
        o_ref[:, pl.ds(off, slab)] = out + b3                         # f32 output
        return carry

    if num_slabs == 1:
        slab_body(0, 0)
    else:
        lax.fori_loop(0, num_slabs, slab_body, 0)


def network_forward(x, params, *, tb=TB_DEFAULT, lane_major_out=False):
    """x: (B, 11) float32. Returns (B, 2) float32 (or (2, B) if lane_major_out)."""
    B, F = x.shape
    assert F == IN_FEATURES, f"expected {IN_FEATURES} input features, got {F}"
    if tb % 128 != 0:
        raise ValueError(f"tb must be a multiple of 128, got {tb}")

    if B <= 128:
        tb_eff = B                                    # single full-array block
    else:
        # >=2 grid steps whenever possible (v7x megacore), lane-aligned tile.
        tb_eff = min(tb, max(128, _round_up(pl.cdiv(B, 2), 128)))
    grid_n = pl.cdiv(B, tb_eff)                       # partial edge block allowed

    # In-kernel slab width: largest of (512, 256, 128) dividing the tile.
    slab = tb_eff
    for s in (512, 256, 128):
        if tb_eff % s == 0:
            slab = s
            break
    num_slabs = tb_eff // slab

    w1 = params["w1"].astype(jnp.bfloat16)            # (64, 11)
    w2 = params["w2"].astype(jnp.bfloat16)            # (32, 64)
    w3 = params["w3"].astype(jnp.bfloat16)            # (2, 32)
    b1 = params["b1"].astype(jnp.bfloat16)            # (64, 1)
    b2 = params["b2"].astype(jnp.bfloat16)            # (32, 1)
    b3 = params["b3"]                                  # (2, 1) f32

    def const(arr):
        return pl.BlockSpec(arr.shape, lambda i: (0, 0))

    # VMEM budget: x blocks are lane-padded 11->128 (f32, double-buffered),
    # out blocks sublane-padded 2->8; explicit limit covers v5e's smaller default.
    est = 2 * tb_eff * 128 * 4 + 2 * tb_eff * 8 * 4 + (4 << 20)
    vmem_limit = int(min(max(est, 32 << 20), 96 << 20))

    kernel = functools.partial(_mlp_kernel, slab=slab, num_slabs=num_slabs)

    out = pl.pallas_call(
        kernel,
        out_shape=jax.ShapeDtypeStruct((2, B), jnp.float32),
        grid=(grid_n,),
        in_specs=[
            pl.BlockSpec((tb_eff, IN_FEATURES), lambda i: (i, 0)),   # streamed x
            const(w1), const(b1),
            const(w2), const(b2),
            const(w3), const(b3),
        ],
        out_specs=pl.BlockSpec((2, tb_eff), lambda i: (0, i)),       # lane-dense
        compiler_params=pltpu.CompilerParams(
            dimension_semantics=("parallel",),
            vmem_limit_bytes=vmem_limit,
        ),
    )(x, w1, b1, w2, b2, w3, b3)

    if lane_major_out:
        return out                                     # (2, B), no extra HBM pass
    return out.T                                       # (B, 2), matches nn.Module


def init_params(key):
    """nn.Linear-style init: U(-1/sqrt(fan_in), 1/sqrt(fan_in)).
    Weights in PyTorch layout (out_features, in_features); biases (out, 1)."""
    def linear(key, fan_in, fan_out):
        kw, kb = jax.random.split(key)
        bound = 1.0 / jnp.sqrt(fan_in)
        w = jax.random.uniform(kw, (fan_out, fan_in), jnp.float32, -bound, bound)
        b = jax.random.uniform(kb, (fan_out, 1), jnp.float32, -bound, bound)
        return w, b

    k1, k2, k3 = jax.random.split(key, 3)
    w1, b1 = linear(k1, 11, 64)
    w2, b2 = linear(k2, 64, 32)
    w3, b3 = linear(k3, 32, 2)
    return {"w1": w1, "b1": b1, "w2": w2, "b2": b2, "w3": w3, "b3": b3}


def _reference_forward(x, params):
    """Pure-JAX reference mirroring the kernel's bf16/f32 numerics."""
    xb = x.astype(jnp.bfloat16)
    w1 = params["w1"].astype(jnp.bfloat16)
    w2 = params["w2"].astype(jnp.bfloat16)
    w3 = params["w3"].astype(jnp.bfloat16)
    b1 = params["b1"].astype(jnp.bfloat16)
    b2 = params["b2"].astype(jnp.bfloat16)
    h1 = jnp.dot(xb, w1.T, preferred_element_type=jnp.float32).astype(jnp.bfloat16)
    h1 = jnp.maximum(h1 + b1.T, 0)
    h2 = jnp.dot(h1, w2.T, preferred_element_type=jnp.float32).astype(jnp.bfloat16)
    h2 = jnp.maximum(h2 + b2.T, 0)
    return jnp.dot(h2, w3.T, preferred_element_type=jnp.float32) + params["b3"].T


if __name__ == "__main__":
    key = jax.random.PRNGKey(0)
    k_params, k1, k2, k3 = jax.random.split(key, 4)
    params = init_params(k_params)

    # 1) Tiny batch: single exact full-array block.
    x_small = jax.random.normal(k1, (8, IN_FEATURES), jnp.float32)
    out_small = jax.block_until_ready(network_forward(x_small, params))
    ref_small = _reference_forward(x_small, params)
    assert out_small.shape == (8, 2), out_small.shape
    assert jnp.allclose(out_small, ref_small, atol=1e-2, rtol=1e-2), \
        "mismatch vs reference (small batch)"

    # 2) Non-divisible batch, multiple grid steps: partial edge block + resident weights.
    x_tiled = jax.random.normal(k2, (300, IN_FEATURES), jnp.float32)
    out_tiled = jax.block_until_ready(network_forward(x_tiled, params, tb=128))
    ref_tiled = _reference_forward(x_tiled, params)
    assert out_tiled.shape == (300, 2), out_tiled.shape
    assert jnp.allclose(out_tiled, ref_tiled, atol=1e-2, rtol=1e-2), \
        "mismatch vs reference (partial edge block)"

    # 3) Larger batch: exercises the in-kernel slab loop (num_slabs > 1) and a 2-step grid.
    x_big = jax.random.normal(k3, (4096, IN_FEATURES), jnp.float32)
    out_big = jax.block_until_ready(network_forward(x_big, params))
    ref_big = _reference_forward(x_big, params)
    assert out_big.shape == (4096, 2), out_big.shape
    assert jnp.allclose(out_big, ref_big, atol=1e-2, rtol=1e-2), \
        "mismatch vs reference (multi-slab tile)"

    print("KERNEL_OK")
</pallas_src>

<mosaic_0001>
module attributes {stable_mosaic.version = 11 : i64} {
  func.func @_mlp_kernel(%arg0: i32, %arg1: memref<8x11xf32, #tpu.memory_space<vmem>>, %arg2: memref<64x11xbf16, #tpu.memory_space<vmem>>, %arg3: memref<64x1xbf16, #tpu.memory_space<vmem>>, %arg4: memref<32x64xbf16, #tpu.memory_space<vmem>>, %arg5: memref<32x1xbf16, #tpu.memory_space<vmem>>, %arg6: memref<2x32xbf16, #tpu.memory_space<vmem>>, %arg7: memref<2x1xf32, #tpu.memory_space<vmem>>, %arg8: memref<2x8xf32, #tpu.memory_space<vmem>>) attributes {dimension_semantics = [#tpu.dimension_semantics<parallel>], iteration_bounds = array<i64: 1>, scalar_prefetch = 0 : i64, scratch_operands = 0 : i64, tpu.core_type = #tpu.core_type<tc>, window_params = [{transform_indices = @transform_0, window_bounds = array<i64: 8, 11>}, {pipeline_mode = #tpu.pipeline_mode<synchronous>, transform_indices = @transform_1, window_bounds = array<i64: 64, 11>}, {pipeline_mode = #tpu.pipeline_mode<synchronous>, transform_indices = @transform_2, window_bounds = array<i64: 64, 1>}, {pipeline_mode = #tpu.pipeline_mode<synchronous>, transform_indices = @transform_3, window_bounds = array<i64: 32, 64>}, {pipeline_mode = #tpu.pipeline_mode<synchronous>, transform_indices = @transform_4, window_bounds = array<i64: 32, 1>}, {pipeline_mode = #tpu.pipeline_mode<synchronous>, transform_indices = @transform_5, window_bounds = array<i64: 2, 32>}, {pipeline_mode = #tpu.pipeline_mode<synchronous>, transform_indices = @transform_6, window_bounds = array<i64: 2, 1>}, {transform_indices = @transform_7, window_bounds = array<i64: 2, 8>}]} {
    %c0 = arith.constant 0 : index
    %c0_0 = arith.constant 0 : index
    %0 = vector.load %arg2[%c0, %c0_0] : memref<64x11xbf16, #tpu.memory_space<vmem>>, vector<64x11xbf16>
    %c0_1 = arith.constant 0 : index
    %c0_2 = arith.constant 0 : index
    %1 = vector.load %arg3[%c0_1, %c0_2] : memref<64x1xbf16, #tpu.memory_space<vmem>>, vector<64x1xbf16>
    %c0_3 = arith.constant 0 : index
    %c0_4 = arith.constant 0 : index
    %2 = vector.load %arg4[%c0_3, %c0_4] : memref<32x64xbf16, #tpu.memory_space<vmem>>, vector<32x64xbf16>
    %c0_5 = arith.constant 0 : index
    %c0_6 = arith.constant 0 : index
    %3 = vector.load %arg5[%c0_5, %c0_6] : memref<32x1xbf16, #tpu.memory_space<vmem>>, vector<32x1xbf16>
    %c0_7 = arith.constant 0 : index
    %c0_8 = arith.constant 0 : index
    %4 = vector.load %arg6[%c0_7, %c0_8] : memref<2x32xbf16, #tpu.memory_space<vmem>>, vector<2x32xbf16>
    %c0_9 = arith.constant 0 : index
    %c0_10 = arith.constant 0 : index
    %5 = vector.load %arg7[%c0_9, %c0_10] : memref<2x1xf32, #tpu.memory_space<vmem>>, vector<2x1xf32>
    %c0_11 = arith.constant 0 : index
    %c0_12 = arith.constant 0 : index
    %6 = vector.load %arg1[%c0_11, %c0_12] : memref<8x11xf32, #tpu.memory_space<vmem>>, vector<8x11xf32>
    %7 = arith.truncf %6 : vector<8x11xf32> to vector<8x11xbf16>
    %cst = arith.constant dense<0.000000e+00> : vector<64x8xf32>
    %8 = tpu.matmul %0, %7, %cst {dimension_numbers = #tpu.dot_dimension_numbers<[1], [1], [0], [0], [0, 0, 1, 0], [], []>} : vector<64x11xbf16>, vector<8x11xbf16>, vector<64x8xf32> -> vector<64x8xf32>
    %9 = arith.truncf %8 : vector<64x8xf32> to vector<64x8xbf16>
    %10 = vector.broadcast %1 : vector<64x1xbf16> to vector<64x8xbf16>
    %11 = arith.addf %9, %10 : vector<64x8xbf16>
    %cst_13 = arith.constant 0.000000e+00 : bf16
    %12 = vector.broadcast %cst_13 : bf16 to vector<64x8xbf16>
    %13 = arith.maximumf %11, %12 : vector<64x8xbf16>
    %cst_14 = arith.constant dense<0.000000e+00> : vector<32x8xf32>
    %14 = tpu.matmul %2, %13, %cst_14 {dimension_numbers = #tpu.dot_dimension_numbers<[1], [0], [0], [1], [0, 0, 1, 1], [], []>} : vector<32x64xbf16>, vector<64x8xbf16>, vector<32x8xf32> -> vector<32x8xf32>
    %15 = arith.truncf %14 : vector<32x8xf32> to vector<32x8xbf16>
    %16 = vector.broadcast %3 : vector<32x1xbf16> to vector<32x8xbf16>
    %17 = arith.addf %15, %16 : vector<32x8xbf16>
    %cst_15 = arith.constant 0.000000e+00 : bf16
    %18 = vector.broadcast %cst_15 : bf16 to vector<32x8xbf16>
    %19 = arith.maximumf %17, %18 : vector<32x8xbf16>
    %cst_16 = arith.constant dense<0.000000e+00> : vector<2x8xf32>
    %20 = tpu.matmul %4, %19, %cst_16 {dimension_numbers = #tpu.dot_dimension_numbers<[1], [0], [0], [1], [0, 0, 1, 1], [], []>} : vector<2x32xbf16>, vector<32x8xbf16>, vector<2x8xf32> -> vector<2x8xf32>
    %21 = vector.broadcast %5 : vector<2x1xf32> to vector<2x8xf32>
    %22 = arith.addf %20, %21 : vector<2x8xf32>
    %c0_17 = arith.constant 0 : index
    %c0_18 = arith.constant 0 : index
    %23 = vector.load %arg8[%c0_17, %c0_18] : memref<2x8xf32, #tpu.memory_space<vmem>>, vector<2x8xf32>
    tpu.vector_store %arg8[%c0_17, %c0_18], %22 {strides = array<i32>} : memref<2x8xf32, #tpu.memory_space<vmem>>, vector<2x8xf32>,
    return
  }
  func.func @transform_0(%arg0: i32) -> (i32, i32) {
    %c0_i32 = arith.constant 0 : i32
    %c0_i32_0 = arith.constant 0 : i32
    return %arg0, %c0_i32 : i32, i32
  }
  func.func @transform_1(%arg0: i32) -> (i32, i32) {
    %c0_i32 = arith.constant 0 : i32
    %c0_i32_0 = arith.constant 0 : i32
    %c0_i32_1 = arith.constant 0 : i32
    return %c0_i32, %c0_i32_0 : i32, i32
  }
  func.func @transform_2(%arg0: i32) -> (i32, i32) {
    %c0_i32 = arith.constant 0 : i32
    %c0_i32_0 = arith.constant 0 : i32
    %c0_i32_1 = arith.constant 0 : i32
    return %c0_i32, %c0_i32_0 : i32, i32
  }
  func.func @transform_3(%arg0: i32) -> (i32, i32) {
    %c0_i32 = arith.constant 0 : i32
    %c0_i32_0 = arith.constant 0 : i32
    %c0_i32_1 = arith.constant 0 : i32
    return %c0_i32, %c0_i32_0 : i32, i32
  }
  func.func @transform_4(%arg0: i32) -> (i32, i32) {
    %c0_i32 = arith.constant 0 : i32
    %c0_i32_0 = arith.constant 0 : i32
    %c0_i32_1 = arith.constant 0 : i32
    return %c0_i32, %c0_i32_0 : i32, i32
  }
  func.func @transform_5(%arg0: i32) -> (i32, i32) {
    %c0_i32 = arith.constant 0 : i32
    %c0_i32_0 = arith.constant 0 : i32
    %c0_i32_1 = arith.constant 0 : i32
    return %c0_i32, %c0_i32_0 : i32, i32
  }
  func.func @transform_6(%arg0: i32) -> (i32, i32) {
    %c0_i32 = arith.constant 0 : i32
    %c0_i32_0 = arith.constant 0 : i32
    %c0_i32_1 = arith.constant 0 : i32
    return %c0_i32, %c0_i32_0 : i32, i32
  }
  func.func @transform_7(%arg0: i32) -> (i32, i32) {
    %c0_i32 = arith.constant 0 : i32
    %c0_i32_0 = arith.constant 0 : i32
    return %c0_i32, %arg0 : i32, i32
  }
}

</mosaic_0001>

<bundles_post_ra>
// kernel: tpu_custom_call.1
= control target key start
LH: loop header
LB: loop body
LE: loop exit
PB: predicated region body
PF: predicated region fallthrough
CT: control target
= control target key end

     0   :  { %vm76_vm0 = vcmask 89088   ;;  %v465_v3 = vmov 0   ;;  %s593_s0 = inlined_call_operand.vmem [shape: f32[8,11], index: 0, kind: input, shape index: {}]   ;;  %s594_s1 = inlined_call_operand.vmem [shape: bf16[64,11], index: 1, kind: input, shape index: {}]   ;;  %s595_s2 = inlined_call_operand.vmem [shape: bf16[64,1], index: 2, kind: input, shape index: {}]   ;;  %s596_s3 = inlined_call_operand.vmem [shape: bf16[32,64], index: 3, kind: input, shape index: {}]   ;;  %s597_s4 = inlined_call_operand.vmem [shape: bf16[32,1], index: 4, kind: input, shape index: {}]   ;;  %s598_s5 = inlined_call_operand.vmem [shape: bf16[2,32], index: 5, kind: input, shape index: {}]   ;;  %s599_s6 = inlined_call_operand.vmem [shape: f32[2,1], index: 6, kind: input, shape index: {}]   ;;  %s600_s7 = inlined_call_operand.hbm [shape: f32[2,8], index: 7, kind: output, shape index: {}]  }
   0x1   :  { %v54_v0 = vld [vmem:[%s593_s0] sm:$0xff]  ;;  %v42_v1 = vld [vmem:[%s595_s2 + $0x18] sm:$0xf]  ;;  %436 = vset.pattern.permute.xlu0 %v465_v3  ;;  %437 = vset.pattern.permute.xlu1 %v465_v3  ;;  %v40_v4 = vld [vmem:[%s595_s2 + $0x10] sm:$0xf] }
   0x2   :  { %v55_v2 = vpack.c.bf16 %v54_v0, %v54_v0  ;;  %185 = vperm.xlu0 %436, %v42_v1   ;;  %167 = vperm.xlu1 %437, %v40_v4   ;;  %v38_v6 = vld [vmem:[%s595_s2 + $0x8] sm:$0xf]  ;;  %v428_v7 = vld [vmem:[%s594_s1 + $0x10] sm:$0xff] }
   0x3   :  { %438 = vset.pattern.permute.xlu2 %v465_v3 }
   0x4   :  { %v90_v5 = vsel %vm76_vm0, %v55_v2, 0  ;;  %149 = vperm.xlu2 %438, %v38_v6  }
   0x5   :  { %432 = vmatpush.bf16.xpose.msra.mxu3 %v90_v5  ;;  %99 = vmatpush.bf16.xpose.msra.mxu0 %v90_v5 }
   0x6   :  { %12 = vsyncpa [#allocation3], 0  ;;  %v426_v8 = vld [vmem:[%s594_s1] sm:$0xff]  ;;  %v43_v9 = vld [vmem:[%s595_s2 + $0x1c] sm:$0xf]  ;;  %vm263_vm1 = vcmask 523264  }
   0x7   :  { %v41_v10 = vld [vmem:[%s595_s2 + $0x14] sm:$0xf]  ;;  %v39_v11 = vld [vmem:[%s595_s2 + $0xc] sm:$0xf]  ;;  %v36_v12 = vld [vmem:[%s595_s2] sm:$0xf] }
   0x8   :  { %v37_v13 = vld [vmem:[%s595_s2 + $0x4] sm:$0xf]  ;;  %v50_v14 = vld [vmem:[%s597_s4 + $0x8] sm:$0xf]  ;;  %v429_v15 = vld [vmem:[%s594_s1 + $0x18] sm:$0xff]  ;;  %vm360_vm2 = vcmask 261120  }
   0x9   :  { %v427_v16 = vld [vmem:[%s594_s1 + $0x8] sm:$0xff]  ;;  %v48_v18 = vld [vmem:[%s597_s4] sm:$0xf]  ;;  %v49_v19 = vld [vmem:[%s597_s4 + $0x4] sm:$0xf]  ;;  %s467_s13 = smov [#allocation2]  }
   0xa   :  { %194 = vperm.xlu0 %436, %v43_v9   ;;  %176 = vperm.xlu1 %437, %v41_v10   ;;  %v51_v17 = vld [vmem:[%s597_s4 + $0xc] sm:$0xf]  ;;  %v53_v20 = vld [vmem:[%s599_s6] sm:$0x3]  ;;  %v466_v29 = vmov 839922192  }
   0xb   :  { %v135_v30 = vunpack.c.l.s4 %v466_v29  ;;  %v431_v29 = vld [vmem:[%s596_s3 + $0x8] sm:$0xff]  ;;  %s384_s14 = sshll.u32 %s467_s13, 4  ;;  %s386_s17 = sshll.u32 %s600_s7, 4  ;;  %vm377_vm3 = vcmask 58368   ;;  %s385_s14 = int_to_ptr.vmem [resolvable:$true] %s384_s14  ;;  %s387_s17 = int_to_ptr.hbm [resolvable:$true] %s386_s17 }
   0xc   :  { %413 = vmatmul.msk.bf16.vlgmr.msra.gmra.mxu3 %vm76_vm0, %v428_v7  ;;  %411 = vmatmul.msk.bf16.vlgmr.msra.gmra.mxu0 %vm76_vm0, %v426_v8 }
   0xd   :  { %158 = vperm.xlu2 %438, %v39_v11   ;;  %v567_v33 = vunpack.c.0.s8 %v135_v30 }
  0x12   :  { %131 = vperm.xlu0 %436, %v36_v12   ;;  %140 = vperm.xlu1 %437, %v37_v13  }
  0x15   :  { %313 = vperm.xlu2 %438, %v50_v14  }
  0x1a   :  { %322 = vperm.xlu0 %436, %v51_v17   ;;  %295 = vperm.xlu1 %437, %v48_v18  }
  0x1c   :  { %414 = vmatmul.msk.bf16.gmra.mxu3 %vm76_vm0, %v429_v15  ;;  %412 = vmatmul.msk.bf16.gmra.mxu0 %vm76_vm0, %v427_v16 }
  0x1d   :  { %304 = vperm.xlu2 %438, %v49_v19  }
  0x22   :  { %357 = vperm.xlu0 %436, %v53_v20  }
  0x5e   :  { %v150_v27 = vpop.permute.xlu2 %149 }
  0x5f   :  { %v155_v41 = vperm.slane %v150_v27, %v567_v33 }
  0x61   :  { %v211_v56 = vunpack.c.l.bf16 %v155_v41 }
  0x67   :  { %v159_v38 = vpop.permute.xlu2 %158 }
  0x68   :  { %v164_v42 = vperm.slane %v159_v38, %v567_v33 }
  0x6a   :  { %v212_v57 = vunpack.c.l.bf16 %v164_v42 }
  0x74   :  { %v168_v24 = vpop.permute.xlu1 %167  ;;  %v186_v25 = vpop.permute.xlu0 %185 }
  0x75   :  { %v191_v35 = vperm.slane %v186_v25, %v567_v33  ;;  %v173_v40 = vperm.slane %v168_v24, %v567_v33 }
  0x77   :  { %v215_v44 = vunpack.c.l.bf16 %v191_v35  ;;  %v213_v55 = vunpack.c.l.bf16 %v173_v40 }
  0x7c   :  { %v177_v31 = vpop.permute.xlu1 %176  ;;  %v195_v34 = vpop.permute.xlu0 %194 }
  0x7d   :  { %v182_v37 = vperm.slane %v177_v31, %v567_v33  ;;  %v200_v45 = vperm.slane %v195_v34, %v567_v33 }
  0x7f   :  { %v214_v48 = vunpack.c.l.bf16 %v182_v37  ;;  %v216_v58 = vunpack.c.l.bf16 %v200_v45 }
  0x84   :  { %v141_v50 = vpop.permute.xlu1 %140  ;;  %v132_v59 = vpop.permute.xlu0 %131 }
  0x85   :  { %v137_v63 = vperm.slane %v132_v59, %v567_v33  ;;  %v146_v1 = vperm.slane %v141_v50, %v567_v33 }
  0x87   :  { %v209_v10 = vunpack.c.l.bf16 %v137_v63  ;;  %v210_v12 = vunpack.c.l.bf16 %v146_v1 }
  0x89   :  { %v101_v21 = vpop.f32.mrf.mxu0 }
  0x8a   :  { %v121_v0 = vpack.c.bf16 %v101_v21, %v101_v21 }
  0x8c   :  { %v201_v11 = vunpack.c.l.bf16 %v121_v0  ;;  %v296_v40 = vpop.permute.xlu1 %295 }
  0x8e   :  { %v217_v19 = vadd.f32 %v209_v10, %v201_v11 }
  0x8f   :  { %v111_v22 = vpop.f32.mrf.mxu3 }
  0x90   :  { %v125_v46 = vpack.c.bf16 %v111_v22, %v111_v22  ;;  %v241_v25 = vmax.f32 %v217_v19, 0.0 }
  0x91   :  { %v103_v23 = vpop.f32.mrf.mxu0 }
  0x92   :  { %v205_v60 = vunpack.c.l.bf16 %v125_v46  ;;  %v122_v2 = vpack.c.bf16 %v103_v23, %v103_v23 }
  0x94   :  { %v221_v7 = vadd.f32 %v213_v55, %v205_v60  ;;  %v202_v13 = vunpack.c.l.bf16 %v122_v2 }
  0x96   :  { %v245_v18 = vmax.f32 %v221_v7, 0.0  ;;  %v218_v20 = vadd.f32 %v210_v12, %v202_v13 }
  0x97   :  { %v113_v26 = vpop.f32.mrf.mxu3 }
  0x98   :  { %v126_v39 = vpack.c.bf16 %v113_v26, %v113_v26  ;;  %v242_v26 = vmax.f32 %v218_v20, 0.0 }
  0x99   :  { %v106_v28 = vpop.f32.mrf.mxu0 }
  0x9a   :  { %v206_v51 = vunpack.c.l.bf16 %v126_v39  ;;  %v123_v52 = vpack.c.bf16 %v106_v28, %v106_v28  ;;  %v249_v27 = vpack.c.bf16 %v242_v26, %v241_v25  ;;  %v430_v28 = vld [vmem:[%s596_s3] sm:$0xff]  ;;  %v323_v39 = vpop.permute.xlu0 %322 }
  0x9b   :  { %v328_v42 = vperm.slane %v323_v39, %v567_v33 }
  0x9c   :  { %v222_v3 = vadd.f32 %v214_v48, %v206_v51  ;;  %v203_v4 = vunpack.c.l.bf16 %v123_v52 }
  0x9d   :  { %v336_v51 = vunpack.c.l.bf16 %v328_v42 }
  0x9e   :  { %v219_v14 = vadd.f32 %v211_v56, %v203_v4  ;;  %v246_v17 = vmax.f32 %v222_v3, 0.0 }
  0x9f   :  { %v116_v32 = vpop.f32.mrf.mxu3 }
  0xa0   :  { %v127_v36 = vpack.c.bf16 %v116_v32, %v116_v32  ;;  %v251_v22 = vpack.c.bf16 %v246_v17, %v245_v18  ;;  %v243_v23 = vmax.f32 %v219_v14, 0.0  ;;  %v314_v32 = vpop.permute.xlu2 %313 }
  0xa1   :  { %v108_v43 = vpop.f32.mrf.mxu0  ;;  %v319_v37 = vperm.slane %v314_v32, %v567_v33 }
  0xa2   :  { %v207_v47 = vunpack.c.l.bf16 %v127_v36  ;;  %v124_v53 = vpack.c.bf16 %v108_v43, %v108_v43  ;;  %v358_v1 = vpop.permute.xlu0 %357 }
  0xa3   :  { %v335_v46 = vunpack.c.l.bf16 %v319_v37 }
  0xa4   :  { %v223_v62 = vadd.f32 %v215_v44, %v207_v47  ;;  %v204_v5 = vunpack.c.l.bf16 %v124_v53  ;;  %v301_v47 = vperm.slane %v296_v40, %v567_v33 }
  0xa6   :  { %v247_v8 = vmax.f32 %v223_v62, 0.0  ;;  %v220_v15 = vadd.f32 %v212_v57, %v204_v5  ;;  %v333_v55 = vunpack.c.l.bf16 %v301_v47 }
  0xa7   :  { %v118_v49 = vpop.f32.mrf.mxu3 }
  0xa8   :  { %v128_v54 = vpack.c.bf16 %v118_v49, %v118_v49  ;;  %v244_v21 = vmax.f32 %v220_v15, 0.0  ;;  %v305_v35 = vpop.permute.xlu2 %304 }
  0xa9   :  { %v310_v41 = vperm.slane %v305_v35, %v567_v33  ;;  %v52_v33 = vld [vmem:[%s598_s5] sm:$0x1] }
  0xaa   :  { %v208_v61 = vunpack.c.l.bf16 %v128_v54  ;;  %v250_v24 = vpack.c.bf16 %v244_v21, %v243_v23 }
  0xab   :  { %v334_v50 = vunpack.c.l.bf16 %v310_v41 }
  0xac   :  { %v224_v6 = vadd.f32 %v216_v58, %v208_v61 }
  0xae   :  { %v248_v9 = vmax.f32 %v224_v6, 0.0 }
  0xb0   :  { %v252_v16 = vpack.c.bf16 %v248_v9, %v247_v8 }
  0xb2   :  { %274 = vmatpush.bf16.msra.mxu1 %v252_v16 }
  0xb6   :  { %275 = vmatpush.bf16.msra.mxu1 %v251_v22 }
  0xba   :  { %276 = vmatpush.bf16.msra.mxu1 %v250_v24 }
  0xbe   :  { %277 = vmatpush.bf16.msra.mxu1 %v249_v27 }
  0xc1   :  { %423 = vmatmul.msk.bf16.vlgmr.msra.gmra.mxu1 %vm263_vm1, %v430_v28 }
  0xd1   :  { %424 = vmatmul.msk.bf16.gmra.mxu1 %vm263_vm1, %v431_v29 }
 0x13e   :  { %v279_v30 = vpop.f32.mrf.mxu1 }
 0x13f   :  { %v289_v43 = vpack.c.bf16 %v279_v30, %v279_v30 }
 0x141   :  { %v329_v52 = vunpack.c.l.bf16 %v289_v43 }
 0x143   :  { %v337_v58 = vadd.f32 %v333_v55, %v329_v52 }
 0x145   :  { %v349_v63 = vmax.f32 %v337_v58, 0.0 }
 0x146   :  { %v281_v31 = vpop.f32.mrf.mxu1 }
 0x147   :  { %v290_v38 = vpack.c.bf16 %v281_v31, %v281_v31 }
 0x149   :  { %v330_v48 = vunpack.c.l.bf16 %v290_v38 }
 0x14b   :  { %v338_v56 = vadd.f32 %v334_v50, %v330_v48 }
 0x14d   :  { %v350_v62 = vmax.f32 %v338_v56, 0.0 }
 0x14e   :  { %v284_v34 = vpop.f32.mrf.mxu1 }
 0x14f   :  { %v291_v36 = vpack.c.bf16 %v284_v34, %v284_v34  ;;  %v353_v0 = vpack.c.bf16 %v350_v62, %v349_v63 }
 0x151   :  { %v331_v44 = vunpack.c.l.bf16 %v291_v36 }
 0x153   :  { %v339_v54 = vadd.f32 %v335_v46, %v331_v44 }
 0x155   :  { %v351_v59 = vmax.f32 %v339_v54, 0.0 }
 0x156   :  { %v286_v45 = vpop.f32.mrf.mxu1 }
 0x157   :  { %v292_v49 = vpack.c.bf16 %v286_v45, %v286_v45 }
 0x159   :  { %v332_v53 = vunpack.c.l.bf16 %v292_v49 }
 0x15b   :  { %v340_v57 = vadd.f32 %v336_v51, %v332_v53 }
 0x15d   :  { %v352_v60 = vmax.f32 %v340_v57, 0.0 }
 0x15f   :  { %v354_v61 = vpack.c.bf16 %v352_v60, %v351_v59 }
 0x161   :  { %370 = vmatpush.bf16.msra.mxu2 %v354_v61 }
 0x165   :  { %371 = vmatpush.bf16.msra.mxu2 %v353_v0 }
 0x168   :  { %425 = vmatmul.msk.bf16.vlgmr.msra.gmra.mxu2 %vm360_vm2, %v52_v33 }
 0x1eb   :  { %v373_v2 = vpop.f32.mrf.mxu2 }
 0x1ec   :  { %v374_v3 = vadd.f32 %v373_v2, %v358_v1 }
 0x1ee   :  { %378 = vst.msk [vmem:[#allocation2] sm:$0x3] %vm377_vm3, %v374_v3 }
 0x1ef   :  { %389 = dma.vmem_to_hbm [thread:$0]  %s385_s14, 32, %s387_s17, [#allocation3]  }
 0x1f3   :  { %v375_v4 = vpop.f32.mrf.mxu2 }
 0x1f4   :  { %463 = dma.done.wait [#allocation3], 32  }
 0x1f5   :  { %464 = vsyncadd [#allocation3], 4294967264 }
 0x1f6   :  { %394 = vsyncpa [#allocation3], 1 }

</bundles_post_ra>
